<compile_context>
chip_gen: v7x
topology: tpu7x:2x2x1
jax: 0.10.0
libtpu: 0.0.40
codegen_flags: <defaults>
</compile_context>

<pallas_src>
import functools

import jax
import jax.numpy as jnp
from jax import lax
from jax.experimental import pallas as pl
from jax.experimental.pallas import tpu as pltpu


# --------------------------------------------------------------------------------------
# Kernel
# --------------------------------------------------------------------------------------
def _contrastive_kernel(p1_ref, p2_ref, out_ref, acc_d, acc_ab, acc_x, *,
                        feat, feat_tile, tiles_total, tiles_per_split,
                        ragged, need_mask):
    """Feature-tiled accumulation of (diag, ab, cross) sufficient statistics.

    Grid = (num_splits [parallel], tiles_per_split [arbitrary]).
    p1_ref, p2_ref : (B, tf) VMEM tiles (native dtype, upcast to f32 here)
    out_ref        : (1, 8, 128) f32  -- per-split partial stats in [0, 0, 0:3]
    acc_d, acc_ab  : (B, tf) f32 elementwise accumulators (persist across the inner axis)
    acc_x          : (1, tf) f32 cross-term accumulator
    """
    s = pl.program_id(0)
    k = pl.program_id(1)

    @pl.when(k == 0)
    def _init():
        acc_d[...] = jnp.zeros_like(acc_d)
        acc_ab[...] = jnp.zeros_like(acc_ab)
        acc_x[...] = jnp.zeros_like(acc_x)

    a = p1_ref[...].astype(jnp.float32)   # (B, tf)
    b = p2_ref[...].astype(jnp.float32)   # (B, tf)

    def accumulate(a_v, b_v):
        d = a_v - b_v
        # Elementwise accumulation (batch-axis reduction deferred to finalize);
        # only the cross term needs per-step column sums over the batch.
        acc_d[...] += d * d
        acc_ab[...] += a_v * b_v
        acc_x[...] += (jnp.sum(a_v, axis=0, keepdims=True) *
                       jnp.sum(b_v, axis=0, keepdims=True))

    if need_mask:
        # Global tile index of this grid step (splits cover contiguous tile ranges).
        g = s * tiles_per_split + k
        # Tiles needing a mask: the ragged array-edge tile (g == tiles_total-1) and/or
        # "phantom" steps past the end (g >= tiles_total, possible when the tile count is
        # not divisible by the split count; their DMA index is clamped in the index_map).
        threshold = (tiles_total - 1) if ragged else tiles_total
        special = g >= threshold

        @pl.when(jnp.logical_not(special))
        def _fast():
            accumulate(a, b)

        @pl.when(special)
        def _masked():
            lane = lax.broadcasted_iota(jnp.int32, a.shape, 1)
            valid = (g * feat_tile + lane) < feat   # all-False on phantom steps
            accumulate(jnp.where(valid, a, 0.0), jnp.where(valid, b, 0.0))
    else:
        accumulate(a, b)

    @pl.when(k == pl.num_programs(1) - 1)
    def _finalize():
        diag = jnp.sum(acc_d[...])
        ab = jnp.sum(acc_ab[...])
        cross = jnp.sum(acc_x[...])
        row = lax.broadcasted_iota(jnp.int32, (8, 128), 0)
        lane = lax.broadcasted_iota(jnp.int32, (8, 128), 1)
        first = row == 0
        vals = jnp.where(first & (lane == 0), diag, 0.0)
        vals = jnp.where(first & (lane == 1), ab, vals)
        vals = jnp.where(first & (lane == 2), cross, vals)
        out_ref[...] = vals[None]   # (1, 8, 128)


# --------------------------------------------------------------------------------------
# Tile sizing / VMEM budgeting
# --------------------------------------------------------------------------------------
def _vmem_capacity_bytes():
    try:
        info = pltpu.get_tpu_info()
        cap = getattr(info, "vmem_capacity_bytes", None)
        if cap:
            return int(cap)
    except Exception:
        pass
    return 64 * 1024 * 1024   # conservative fallback (v7x per-TensorCore VMEM)


def _pick_feat_tile(feat, batch, itemsize, feat_tile):
    """Pick the lane-tile width.

    Default: target ~4 MiB per input block (enough to amortize the ~0.35 us/step grid
    overhead and approach the HBM roofline) under a generation-aware total-VMEM budget
    that accounts for 2 inputs x 2 pipeline buffers plus the f32 scratch accumulators.
    """
    if feat_tile is not None:
        tf = max(128, (int(feat_tile) // 128) * 128)
        return min(feat, tf)

    b_pad = ((batch + 7) // 8) * 8                 # sublane padding of (B, tf) tiles
    vmem_cap = _vmem_capacity_bytes()
    budget = max(24 << 20, min(vmem_cap - (16 << 20), 80 << 20))
    per_col = (4 * b_pad * itemsize                # 2 inputs x 2 pipeline buffers
               + 2 * b_pad * 4                     # acc_d + acc_ab (f32, single-buffered)
               + 8 * 4)                            # acc_x (1, tf) f32, sublane-padded
    tf_budget = max(128, (budget // per_col // 128) * 128)
    tf_block = max(128, ((4 << 20) // (b_pad * itemsize) // 128) * 128)
    tf = min(tf_budget, tf_block)
    return feat if feat <= tf else tf


# --------------------------------------------------------------------------------------
# Wrapper
# --------------------------------------------------------------------------------------
def contrastive_loss_pallas(pos1, pos2, *, feat_tile=None):
    """Pallas implementation of ContrastiveLoss.forward(pos1, pos2)."""
    assert pos1.shape == pos2.shape
    batch = pos1.shape[0]
    # Keep native dtype (bf16 passes straight through -> half the HBM traffic);
    # the kernel upcasts to f32 after load.
    x1 = jnp.asarray(pos1).reshape(batch, -1)
    x2 = jnp.asarray(pos2).reshape(batch, -1)
    feat = x1.shape[1]
    itemsize = jnp.dtype(x1.dtype).itemsize

    tf = _pick_feat_tile(feat, batch, itemsize, feat_tile)
    tiles_total = pl.cdiv(feat, tf)

    # Split the feature range across two TensorCores when there is enough work
    # ("parallel" leading axis -> sharded on v7x megacore, plain sequential loop on v5e/v6e).
    num_splits = 2 if tiles_total >= 2 else 1
    tiles_per_split = pl.cdiv(tiles_total, num_splits)

    ragged = (feat % tf) != 0
    phantom = (num_splits * tiles_per_split) != tiles_total
    need_mask = ragged or phantom

    last_blk = tiles_total - 1

    def in_map(s, k):
        # Clamp phantom steps (past the end of the tile range) to the last real block;
        # the kernel fully masks their contribution.
        return (0, jnp.minimum(s * tiles_per_split + k, last_blk))

    kernel = functools.partial(
        _contrastive_kernel,
        feat=feat, feat_tile=tf, tiles_total=tiles_total,
        tiles_per_split=tiles_per_split, ragged=ragged, need_mask=need_mask)

    # VMEM budget estimate (inputs double-buffered + f32 accumulators) -> compiler limit.
    b_pad = ((batch + 7) // 8) * 8
    est = (4 * b_pad * tf * itemsize       # input pipeline buffers
           + 2 * b_pad * tf * 4            # acc_d + acc_ab
           + 8 * tf * 4                    # acc_x (padded)
           + (1 << 20))                    # misc / outputs
    vmem_cap = _vmem_capacity_bytes()
    vmem_limit = int(min(vmem_cap - (4 << 20), max(32 << 20, est * 3 // 2)))

    out = pl.pallas_call(
        kernel,
        out_shape=jax.ShapeDtypeStruct((num_splits, 8, 128), jnp.float32),
        grid_spec=pltpu.PrefetchScalarGridSpec(
            num_scalar_prefetch=0,
            grid=(num_splits, tiles_per_split),
            in_specs=[
                pl.BlockSpec((batch, tf), in_map),
                pl.BlockSpec((batch, tf), in_map),
            ],
            out_specs=pl.BlockSpec((1, 8, 128), lambda s, k: (s, 0, 0)),
            scratch_shapes=[
                pltpu.VMEM((batch, tf), jnp.float32),   # (a-b)^2 elementwise partials
                pltpu.VMEM((batch, tf), jnp.float32),   # a*b elementwise partials
                pltpu.VMEM((1, tf), jnp.float32),       # colsum(a)*colsum(b) partials
            ],
        ),
        compiler_params=pltpu.CompilerParams(
            dimension_semantics=("parallel", "arbitrary"),
            vmem_limit_bytes=vmem_limit,
        ),
        cost_estimate=pl.CostEstimate(
            flops=6 * batch * feat,
            transcendentals=0,
            bytes_accessed=2 * batch * feat * itemsize,
        ),
    )(x1, x2)

    # Fold per-split partial statistics and apply the closed-form loss.
    stats = out[:, 0, 0:3]                      # (num_splits, 3)
    diag = jnp.sum(stats[:, 0])                 # trace(D) = sum((x1_i - x2_i)^2)
    ab = jnp.sum(stats[:, 1])                   # sum_i <x1_i, x2_i>
    cross = jnp.sum(stats[:, 2])                # <sum_i x1_i, sum_j x2_j>

    pos_loss = diag / batch
    if batch == 1:
        return pos_loss
    sqsum = diag + 2.0 * ab                     # sum ||x1||^2 + sum ||x2||^2
    off_sum = batch * sqsum - 2.0 * cross - diag
    neg_loss = -off_sum / (batch * (batch - 1))
    return pos_loss + neg_loss


# --------------------------------------------------------------------------------------
# Pure-JAX reference (mirrors the PyTorch double loop)
# --------------------------------------------------------------------------------------
def contrastive_loss_ref(pos1, pos2):
    batch = pos1.shape[0]
    x1 = jnp.asarray(pos1).reshape(batch, -1).astype(jnp.float32)
    x2 = jnp.asarray(pos2).reshape(batch, -1).astype(jnp.float32)
    diff = x1[:, None, :] - x2[None, :, :]          # (B, B, F)
    d = jnp.sum(diff * diff, axis=-1)               # (B, B)
    pos_loss = jnp.trace(d) / batch
    if batch == 1:
        return pos_loss
    off = jnp.sum(d) - jnp.trace(d)
    neg_loss = -off / (batch * (batch - 1))
    return pos_loss + neg_loss


if __name__ == "__main__":
    key = jax.random.PRNGKey(0)
    k1, k2, k3, k4 = jax.random.split(key, 4)

    # 1) canonical NCHW case: B=2, C=4, H=W=16 -> F=1024, auto tile (single block)
    p1 = jax.random.normal(k1, (2, 4, 16, 16), dtype=jnp.float32)
    p2 = jax.random.normal(k2, (2, 4, 16, 16), dtype=jnp.float32)
    loss = contrastive_loss_pallas(p1, p2)
    jax.block_until_ready(loss)
    ref = contrastive_loss_ref(p1, p2)
    assert jnp.allclose(loss, ref, rtol=1e-3, atol=1e-2), (loss, ref)

    # 2) multi-tile, evenly-split, unmasked fast path: F=1024, tile=256 -> 2 splits x 2 tiles
    loss1b = contrastive_loss_pallas(p1, p2, feat_tile=256)
    jax.block_until_ready(loss1b)
    assert jnp.allclose(loss1b, ref, rtol=1e-3, atol=1e-2), (loss1b, ref)

    # 3) ragged feature axis (F = 3*10*11 = 330) with a small tile: exercises the 2-way
    #    split, the clamped index map (phantom tile) and the in-kernel last-tile mask.
    q1 = jax.random.normal(k3, (3, 3, 10, 11), dtype=jnp.float32)
    q2 = jax.random.normal(k4, (3, 3, 10, 11), dtype=jnp.float32)
    loss2 = contrastive_loss_pallas(q1, q2, feat_tile=128)
    jax.block_until_ready(loss2)
    ref2 = contrastive_loss_ref(q1, q2)
    assert jnp.allclose(loss2, ref2, rtol=1e-3, atol=1e-2), (loss2, ref2)

    # 4) batch == 1 branch (positive term only)
    loss3 = contrastive_loss_pallas(p1[:1], p2[:1])
    jax.block_until_ready(loss3)
    ref3 = contrastive_loss_ref(p1[:1], p2[:1])
    assert jnp.allclose(loss3, ref3, rtol=1e-3, atol=1e-2), (loss3, ref3)

    # 5) bf16 activations stream through untouched (half the HBM bytes), f32 accumulation.
    b1 = p1.astype(jnp.bfloat16)
    b2 = p2.astype(jnp.bfloat16)
    loss4 = contrastive_loss_pallas(b1, b2)
    jax.block_until_ready(loss4)
    ref4 = contrastive_loss_ref(b1, b2)
    assert jnp.allclose(loss4, ref4, rtol=1e-3, atol=5e-2), (loss4, ref4)

    print("KERNEL_OK")
</pallas_src>

<mosaic_0001>
module attributes {stable_mosaic.version = 11 : i64} {
  func.func @_contrastive_kernel(%arg0: i32, %arg1: i32, %arg2: memref<2x1024xf32, #tpu.memory_space<vmem>>, %arg3: memref<2x1024xf32, #tpu.memory_space<vmem>>, %arg4: memref<1x8x128xf32, #tpu.memory_space<vmem>>, %arg5: memref<2x1024xf32, #tpu.memory_space<vmem>>, %arg6: memref<2x1024xf32, #tpu.memory_space<vmem>>, %arg7: memref<1x1024xf32, #tpu.memory_space<vmem>>) attributes {dimension_semantics = [#tpu.dimension_semantics<parallel>, #tpu.dimension_semantics<arbitrary>], iteration_bounds = array<i64: 1, 1>, scalar_prefetch = 0 : i64, scratch_operands = 3 : i64, tpu.core_type = #tpu.core_type<tc>, window_params = [{transform_indices = @transform_0, window_bounds = array<i64: 2, 1024>}, {transform_indices = @transform_1, window_bounds = array<i64: 2, 1024>}, {transform_indices = @transform_2, window_bounds = array<i64: 1, 8, 128>}]} {
    %c0_i32 = arith.constant 0 : i32
    %0 = arith.cmpi eq, %arg1, %c0_i32 : i32
    %1 = arith.extui %0 : i1 to i32
    %c0_i32_0 = arith.constant 0 : i32
    %2 = arith.cmpi ne, %1, %c0_i32_0 : i32
    scf.if %2 {
      %cst_19 = arith.constant 0.000000e+00 : f32
      %25 = vector.broadcast %cst_19 : f32 to vector<2x1024xf32>
      %c0_20 = arith.constant 0 : index
      %c0_21 = arith.constant 0 : index
      %26 = vector.load %arg5[%c0_20, %c0_21] : memref<2x1024xf32, #tpu.memory_space<vmem>>, vector<2x1024xf32>
      tpu.vector_store %arg5[%c0_20, %c0_21], %25 {strides = array<i32>} : memref<2x1024xf32, #tpu.memory_space<vmem>>, vector<2x1024xf32>,
      %cst_22 = arith.constant 0.000000e+00 : f32
      %27 = vector.broadcast %cst_22 : f32 to vector<2x1024xf32>
      %c0_23 = arith.constant 0 : index
      %c0_24 = arith.constant 0 : index
      %28 = vector.load %arg6[%c0_23, %c0_24] : memref<2x1024xf32, #tpu.memory_space<vmem>>, vector<2x1024xf32>
      tpu.vector_store %arg6[%c0_23, %c0_24], %27 {strides = array<i32>} : memref<2x1024xf32, #tpu.memory_space<vmem>>, vector<2x1024xf32>,
      %cst_25 = arith.constant 0.000000e+00 : f32
      %29 = vector.broadcast %cst_25 : f32 to vector<1x1024xf32>
      %c0_26 = arith.constant 0 : index
      %c0_27 = arith.constant 0 : index
      %30 = vector.load %arg7[%c0_26, %c0_27] : memref<1x1024xf32, #tpu.memory_space<vmem>>, vector<1x1024xf32>
      tpu.vector_store %arg7[%c0_26, %c0_27], %29 {strides = array<i32>} : memref<1x1024xf32, #tpu.memory_space<vmem>>, vector<1x1024xf32>,
    } else {
    }
    %c0 = arith.constant 0 : index
    %c0_1 = arith.constant 0 : index
    %3 = vector.load %arg2[%c0, %c0_1] : memref<2x1024xf32, #tpu.memory_space<vmem>>, vector<2x1024xf32>
    %c0_2 = arith.constant 0 : index
    %c0_3 = arith.constant 0 : index
    %4 = vector.load %arg3[%c0_2, %c0_3] : memref<2x1024xf32, #tpu.memory_space<vmem>>, vector<2x1024xf32>
    %5 = arith.subf %3, %4 : vector<2x1024xf32>
    %c0_4 = arith.constant 0 : index
    %c0_5 = arith.constant 0 : index
    %6 = vector.load %arg5[%c0_4, %c0_5] : memref<2x1024xf32, #tpu.memory_space<vmem>>, vector<2x1024xf32>
    %7 = arith.mulf %5, %5 : vector<2x1024xf32>
    %8 = arith.addf %6, %7 : vector<2x1024xf32>
    %c0_6 = arith.constant 0 : index
    %c0_7 = arith.constant 0 : index
    %9 = vector.load %arg5[%c0_6, %c0_7] : memref<2x1024xf32, #tpu.memory_space<vmem>>, vector<2x1024xf32>
    tpu.vector_store %arg5[%c0_6, %c0_7], %8 {strides = array<i32>} : memref<2x1024xf32, #tpu.memory_space<vmem>>, vector<2x1024xf32>,
    %c0_8 = arith.constant 0 : index
    %c0_9 = arith.constant 0 : index
    %10 = vector.load %arg6[%c0_8, %c0_9] : memref<2x1024xf32, #tpu.memory_space<vmem>>, vector<2x1024xf32>
    %11 = arith.mulf %3, %4 : vector<2x1024xf32>
    %12 = arith.addf %10, %11 : vector<2x1024xf32>
    %c0_10 = arith.constant 0 : index
    %c0_11 = arith.constant 0 : index
    %13 = vector.load %arg6[%c0_10, %c0_11] : memref<2x1024xf32, #tpu.memory_space<vmem>>, vector<2x1024xf32>
    tpu.vector_store %arg6[%c0_10, %c0_11], %12 {strides = array<i32>} : memref<2x1024xf32, #tpu.memory_space<vmem>>, vector<2x1024xf32>,
    %c0_12 = arith.constant 0 : index
    %c0_13 = arith.constant 0 : index
    %14 = vector.load %arg7[%c0_12, %c0_13] : memref<1x1024xf32, #tpu.memory_space<vmem>>, vector<1x1024xf32>
    %cst = arith.constant dense<0.000000e+00> : vector<1024xf32>
    %15 = vector.multi_reduction <add>, %3, %cst [0] : vector<2x1024xf32> to vector<1024xf32>
    %16 = vector.shape_cast %15 : vector<1024xf32> to vector<1x1024xf32>
    %cst_14 = arith.constant dense<0.000000e+00> : vector<1024xf32>
    %17 = vector.multi_reduction <add>, %4, %cst_14 [0] : vector<2x1024xf32> to vector<1024xf32>
    %18 = vector.shape_cast %17 : vector<1024xf32> to vector<1x1024xf32>
    %19 = arith.mulf %16, %18 : vector<1x1024xf32>
    %20 = arith.addf %14, %19 : vector<1x1024xf32>
    %c0_15 = arith.constant 0 : index
    %c0_16 = arith.constant 0 : index
    %21 = vector.load %arg7[%c0_15, %c0_16] : memref<1x1024xf32, #tpu.memory_space<vmem>>, vector<1x1024xf32>
    tpu.vector_store %arg7[%c0_15, %c0_16], %20 {strides = array<i32>} : memref<1x1024xf32, #tpu.memory_space<vmem>>, vector<1x1024xf32>,
    %c0_i32_17 = arith.constant 0 : i32
    %22 = arith.cmpi eq, %arg1, %c0_i32_17 : i32
    %23 = arith.extui %22 : i1 to i32
    %c0_i32_18 = arith.constant 0 : i32
    %24 = arith.cmpi ne, %23, %c0_i32_18 : i32
    scf.if %24 {
      %c0_19 = arith.constant 0 : index
      %c0_20 = arith.constant 0 : index
      %25 = vector.load %arg5[%c0_19, %c0_20] : memref<2x1024xf32, #tpu.memory_space<vmem>>, vector<2x1024xf32>
      %26 = vector.shape_cast %25 : vector<2x1024xf32> to vector<1x2x1024xf32>
      %cst_21 = arith.constant dense<0.000000e+00> : vector<1xf32>
      %27 = vector.multi_reduction <add>, %26, %cst_21 [1, 2] : vector<1x2x1024xf32> to vector<1xf32>
      %28 = vector.shape_cast %27 : vector<1xf32> to vector<1x1x1xf32>
      %29 = vector.extract %28[0, 0, 0] : f32 from vector<1x1x1xf32>
      %c0_22 = arith.constant 0 : index
      %c0_23 = arith.constant 0 : index
      %30 = vector.load %arg6[%c0_22, %c0_23] : memref<2x1024xf32, #tpu.memory_space<vmem>>, vector<2x1024xf32>
      %31 = vector.shape_cast %30 : vector<2x1024xf32> to vector<1x2x1024xf32>
      %cst_24 = arith.constant dense<0.000000e+00> : vector<1xf32>
      %32 = vector.multi_reduction <add>, %31, %cst_24 [1, 2] : vector<1x2x1024xf32> to vector<1xf32>
      %33 = vector.shape_cast %32 : vector<1xf32> to vector<1x1x1xf32>
      %34 = vector.extract %33[0, 0, 0] : f32 from vector<1x1x1xf32>
      %c0_25 = arith.constant 0 : index
      %c0_26 = arith.constant 0 : index
      %35 = vector.load %arg7[%c0_25, %c0_26] : memref<1x1024xf32, #tpu.memory_space<vmem>>, vector<1x1024xf32>
      %36 = vector.shape_cast %35 : vector<1x1024xf32> to vector<1x1x1024xf32>
      %cst_27 = arith.constant dense<0.000000e+00> : vector<1xf32>
      %37 = vector.multi_reduction <add>, %36, %cst_27 [1, 2] : vector<1x1x1024xf32> to vector<1xf32>
      %38 = vector.shape_cast %37 : vector<1xf32> to vector<1x1x1xf32>
      %39 = vector.extract %38[0, 0, 0] : f32 from vector<1x1x1xf32>
      %40 = tpu.iota {dimensions = array<i32: 0>} : vector<8x128xi32>
      %41 = tpu.iota {dimensions = array<i32: 1>} : vector<8x128xi32>
      %c0_i32_28 = arith.constant 0 : i32
      %42 = vector.broadcast %c0_i32_28 : i32 to vector<8x128xi32>
      %43 = arith.cmpi eq, %40, %42 : vector<8x128xi32>
      %c0_i32_29 = arith.constant 0 : i32
      %44 = vector.broadcast %c0_i32_29 : i32 to vector<8x128xi32>
      %45 = arith.cmpi eq, %41, %44 : vector<8x128xi32>
      %46 = arith.andi %43, %45 : vector<8x128xi1>
      %cst_30 = arith.constant 0.000000e+00 : f32
      %47 = vector.broadcast %29 : f32 to vector<8x128xf32>
      %48 = vector.broadcast %cst_30 : f32 to vector<8x128xf32>
      %49 = arith.select %46, %47, %48 : vector<8x128xi1>, vector<8x128xf32>
      %c1_i32 = arith.constant 1 : i32
      %50 = vector.broadcast %c1_i32 : i32 to vector<8x128xi32>
      %51 = arith.cmpi eq, %41, %50 : vector<8x128xi32>
      %52 = arith.andi %43, %51 : vector<8x128xi1>
      %53 = vector.broadcast %34 : f32 to vector<8x128xf32>
      %54 = arith.select %52, %53, %49 : vector<8x128xi1>, vector<8x128xf32>
      %c2_i32 = arith.constant 2 : i32
      %55 = vector.broadcast %c2_i32 : i32 to vector<8x128xi32>
      %56 = arith.cmpi eq, %41, %55 : vector<8x128xi32>
      %57 = arith.andi %43, %56 : vector<8x128xi1>
      %58 = vector.broadcast %39 : f32 to vector<8x128xf32>
      %59 = arith.select %57, %58, %54 : vector<8x128xi1>, vector<8x128xf32>
      %60 = vector.shape_cast %59 : vector<8x128xf32> to vector<1x8x128xf32>
      %c0_31 = arith.constant 0 : index
      %c0_32 = arith.constant 0 : index
      %c0_33 = arith.constant 0 : index
      %61 = vector.load %arg4[%c0_31, %c0_32, %c0_33] : memref<1x8x128xf32, #tpu.memory_space<vmem>>, vector<1x8x128xf32>
      tpu.vector_store %arg4[%c0_31, %c0_32, %c0_33], %60 {strides = array<i32>} : memref<1x8x128xf32, #tpu.memory_space<vmem>>, vector<1x8x128xf32>,
    } else {
    }
    return
  }
  func.func @transform_0(%arg0: i32, %arg1: i32) -> (i32, i32) {
    %c1_i32 = arith.constant 1 : i32
    %0 = arith.muli %arg0, %c1_i32 : i32
    %1 = arith.addi %0, %arg1 : i32
    %c0_i32 = arith.constant 0 : i32
    %2 = arith.minsi %1, %c0_i32 : i32
    %c0_i32_0 = arith.constant 0 : i32
    %c0_i32_1 = arith.constant 0 : i32
    return %c0_i32_0, %2 : i32, i32
  }
  func.func @transform_1(%arg0: i32, %arg1: i32) -> (i32, i32) {
    %c1_i32 = arith.constant 1 : i32
    %0 = arith.muli %arg0, %c1_i32 : i32
    %1 = arith.addi %0, %arg1 : i32
    %c0_i32 = arith.constant 0 : i32
    %2 = arith.minsi %1, %c0_i32 : i32
    %c0_i32_0 = arith.constant 0 : i32
    %c0_i32_1 = arith.constant 0 : i32
    return %c0_i32_0, %2 : i32, i32
  }
  func.func @transform_2(%arg0: i32, %arg1: i32) -> (i32, i32, i32) {
    %c0_i32 = arith.constant 0 : i32
    %c0_i32_0 = arith.constant 0 : i32
    %c0_i32_1 = arith.constant 0 : i32
    return %arg0, %c0_i32, %c0_i32_0 : i32, i32, i32
  }
}

</mosaic_0001>

<bundles_post_ra>
// kernel: tpu_custom_call.1
= control target key start
LH: loop header
LB: loop body
LE: loop exit
PB: predicated region body
PF: predicated region fallthrough
CT: control target
= control target key end

     0   :  { %7 = vsyncpa [#allocation6], 0  ;;  %s896_s0 = inlined_call_operand.hbm [shape: f32[2,1024], index: 0, kind: input, shape index: {}]   ;;  %s897_s1 = inlined_call_operand.hbm [shape: f32[2,1024], index: 1, kind: input, shape index: {}]   ;;  %s898_s2 = inlined_call_operand.hbm [shape: f32[1,8,128], index: 2, kind: output, shape index: {}]  }
   0x1   :  { %8 = vsyncpa [#allocation9], 0 }
   0x2   :  { %9 = vsyncpa [#allocation7], 0  ;;  %s692_s9 = smov [#allocation5]   ;;  %s693_s11 = smov [#allocation8]  }
   0x3   :  { %s22_s10 = sshll.u32 %s692_s9, 4  ;;  %s38_s12 = sshll.u32 %s693_s11, 4  ;;  %s23_s10 = int_to_ptr.vmem [resolvable:$true] %s22_s10  ;;  %s39_s12 = int_to_ptr.vmem [resolvable:$true] %s38_s12 }
   0x4   :  { %s620_s15 = scalar_lea.hbm %s896_s0, 256 }
   0x5   :  { %p621_p0 = scmp.ne.s32.totalorder %s896_s0, %s620_s15  ;;  %p624_p1 = scmp.lt.u32.totalorder %s620_s15, %s896_s0 }
   0x7   :  { %p626_p2 = pnand %p624_p1, %p621_p0 }
   0x9   :  { %629 = shalt.err (!%p626_p2)
}
   0xa   :  { %s630_s20 = scalar_lea.vmem %s23_s10, 256  ;;  %p635_p4 = scmp.lt.s32.totalorder %s23_s10, %s23_s10 }
   0xb   :  { %p631_p3 = scmp.ne.s32.totalorder %s23_s10, %s630_s20  ;;  %p636_p5 = scmp.lt.s32.totalorder %s630_s20, %s630_s20 }
   0xd   :  { %p637_p6 = por %p636_p5, %p635_p4 }
   0xf   :  { %p638_p7 = pnand %p637_p6, %p631_p3 }
  0x11   :  { %641 = shalt.err (!%p638_p7)
}
  0x12   :  { %25 = dma.hbm_to_vmem [thread:$0]  %s896_s0, 256, %s23_s10, [#allocation6]  }
  0x13   :  { %s642_s25 = scalar_lea.hbm %s897_s1, 256 }
  0x14   :  { %p643_p8 = scmp.ne.s32.totalorder %s897_s1, %s642_s25  ;;  %p646_p9 = scmp.lt.u32.totalorder %s642_s25, %s897_s1 }
  0x16   :  { %p648_p10 = pnand %p646_p9, %p643_p8 }
  0x18   :  { %651 = shalt.err (!%p648_p10)
}
  0x19   :  { %s652_s30 = scalar_lea.vmem %s39_s12, 256  ;;  %p657_p12 = scmp.lt.s32.totalorder %s39_s12, %s39_s12 }
  0x1a   :  { %p653_p11 = scmp.ne.s32.totalorder %s39_s12, %s652_s30  ;;  %p658_p13 = scmp.lt.s32.totalorder %s652_s30, %s652_s30 }
  0x1c   :  { %p659_p0 = por %p658_p13, %p657_p12 }
  0x1e   :  { %p660_p1 = pnand %p659_p0, %p653_p11 }
  0x20   :  { %663 = shalt.err (!%p660_p1)
}
  0x21   :  { %41 = dma.hbm_to_vmem [thread:$0]  %s897_s1, 256, %s39_s12, [#allocation9]  }
  0x22   :  { %686 = dma.done.wait [#allocation6], 256  }
  0x23   :  { %687 = vsyncadd [#allocation6], 4294967040 }
  0x24   :  { %688 = dma.done.wait [#allocation9], 256  }
  0x25   :  { %689 = vsyncadd [#allocation9], 4294967040  ;;  %v94_v0 = vlaneseq  ;;  %v694_v1 = vmov 1983009808   ;;  %v695_v4 = vmov 1966171168  }
  0x26   :  { %v92_v2 = vunpack.c.l.s4 %v694_v1  ;;  %v310_v5 = vunpack.c.l.s4 %v695_v4  ;;  %v742_v9 = vld [vmem:[#allocation5] sm:$0xff]  ;;  %v744_v10 = vld [vmem:[#allocation5 + $0x8] sm:$0xff]  ;;  %v746_v11 = vld [vmem:[#allocation8] sm:$0xff]  ;;  %vm132_vm0 = vcmask 1041408   ;;  %vm542_vm1 = vcmask 1040384   ;;  %s696_s5 = smov [#allocation10]  }
  0x27   :  { %v737_v3 = vshrl.u32 %v94_v0, 7  ;;  %v751_v13 = vld [vmem:[#allocation8 + $0x8] sm:$0xff]  ;;  %v69_v14 = vsub.f32 %v742_v9, %v746_v11  ;;  %v90_v15 = vcombine.high %v742_v9, %v742_v9  ;;  %v107_v17 = vcombine.high %v744_v10, %v744_v10  ;;  %s591_s6 = sshll.u32 %s696_s5, 4  ;;  %s592_s6 = int_to_ptr.vmem [resolvable:$true] %s591_s6 }
  0x28   :  { %v93_v6 = vunpack.c.0.s8 %v92_v2  ;;  %v311_v7 = vunpack.c.0.s8 %v310_v5  ;;  %v70_v18 = vsub.f32 %v744_v10, %v751_v13  ;;  %v191_v20 = vcombine.high %v746_v11, %v746_v11  ;;  %s664_s8 = scalar_lea.vmem %s592_s6, 128  ;;  %p669_p3 = scmp.lt.s32.totalorder %s592_s6, %s592_s6 }
  0x29   :  { %v771_v22 = vmul.f32 %v69_v14, %v69_v14  ;;  %vm571_vm2 = vcmp.eq.s32.totalorder %v737_v3, 0  ;;  %p665_p2 = scmp.ne.s32.totalorder %s592_s6, %s664_s8  ;;  %p670_p4 = scmp.lt.s32.totalorder %s664_s8, %s664_s8 }
  0x2a   :  { %v740_v8 = vsub.s32 %v93_v6, %v737_v3  ;;  %v749_v12 = vsub.s32 %v311_v7, %v737_v3  ;;  %v775_v26 = vmul.f32 %v70_v18, %v70_v18 }
  0x2b   :  { %p671_p5 = por %p670_p4, %p669_p3 }
  0x2c   :  { %v97_v16 = vrot.slane %v742_v9, %v740_v8  ;;  %v114_v19 = vrot.slane %v744_v10, %v740_v8  ;;  %v769_v21 = vrot.slane %v746_v11, %v740_v8  ;;  %v104_v23 = vrot.slane %v90_v15, %v740_v8 }
  0x2d   :  { %v121_v25 = vrot.slane %v107_v17, %v740_v8  ;;  %p672_p6 = pnand %p671_p5, %p665_p2 }
  0x2e   :  { %v105_v24 = vcombine.high %v97_v16, %v97_v16  ;;  %v122_v27 = vcombine.high %v114_v19, %v114_v19  ;;  %v133_v28 = vsel %vm132_vm0, %v97_v16, 0.0  ;;  %v161_v29 = vsel %vm132_vm0, %v114_v19, 0.0 }
  0x2f   :  { %v106_v30 = vcombine.high %v104_v23, %v104_v23  ;;  %v123_v31 = vcombine.high %v121_v25, %v121_v25  ;;  %v134_v32 = vrot.slane %v133_v28, 4  ;;  %v147_v35 = vsel %vm132_vm0, %v104_v23, 0.0 }
  0x30   :  { %v140_v33 = vsel %vm132_vm0, %v105_v24, 0.0  ;;  %v162_v36 = vrot.slane %v161_v29, 4  ;;  %v168_v37 = vsel %vm132_vm0, %v122_v27, 0.0  ;;  %v148_v39 = vrot.slane %v147_v35, 4 }
  0x31   :  { %v141_v34 = vrot.slane %v140_v33, 4  ;;  %v135_v38 = vadd.f32 %v134_v32, %v133_v28  ;;  %v154_v40 = vsel %vm132_vm0, %v106_v30, 0.0  ;;  %v169_v41 = vrot.slane %v168_v37, 4 }
  0x32   :  { %v155_v43 = vrot.slane %v154_v40, 4  ;;  %v163_v44 = vadd.f32 %v162_v36, %v161_v29  ;;  %v175_v45 = vsel %vm132_vm0, %v121_v25, 0.0  ;;  %v149_v47 = vadd.f32 %v148_v39, %v147_v35 }
  0x33   :  { %v142_v42 = vadd.f32 %v141_v34, %v140_v33  ;;  %v136_v46 = vrot.slane %v135_v38, 2  ;;  %v170_v48 = vadd.f32 %v169_v41, %v168_v37  ;;  %v176_v49 = vrot.slane %v175_v45, 4 }
  0x34   :  { %v156_v51 = vadd.f32 %v155_v43, %v154_v40  ;;  %v164_v52 = vrot.slane %v163_v44, 2  ;;  %v182_v53 = vsel %vm132_vm0, %v123_v31, 0.0  ;;  %v150_v55 = vrot.slane %v149_v47, 2 }
  0x35   :  { %v143_v50 = vrot.slane %v142_v42, 2  ;;  %v137_v54 = vadd.f32 %v136_v46, %v135_v38  ;;  %v171_v56 = vrot.slane %v170_v48, 2  ;;  %v177_v57 = vadd.f32 %v176_v49, %v175_v45 }
  0x36   :  { %v157_v59 = vrot.slane %v156_v51, 2  ;;  %v165_v60 = vadd.f32 %v164_v52, %v163_v44  ;;  %v183_v61 = vrot.slane %v182_v53, 4  ;;  %v151_v63 = vadd.f32 %v150_v55, %v149_v47 }
  0x37   :  { %v144_v58 = vadd.f32 %v143_v50, %v142_v42  ;;  %v138_v62 = vrot.slane %v137_v54, 1  ;;  %v172_v1 = vadd.f32 %v171_v56, %v170_v48  ;;  %v178_v2 = vrot.slane %v177_v57, 2 }
  0x38   :  { %v158_v5 = vadd.f32 %v157_v59, %v156_v51  ;;  %v166_v6 = vrot.slane %v165_v60, 1  ;;  %v184_v7 = vadd.f32 %v183_v61, %v182_v53  ;;  %v152_v15 = vrot.slane %v151_v63, 1 }
  0x39   :  { %v145_v4 = vrot.slane %v144_v58, 1  ;;  %v785_v14 = vadd.f32 %v138_v62, %v137_v54  ;;  %v173_v16 = vrot.slane %v172_v1, 1  ;;  %v179_v17 = vadd.f32 %v178_v2, %v177_v57 }
  0x3a   :  { %v159_v19 = vrot.slane %v158_v5, 1  ;;  %v789_v23 = vadd.f32 %v166_v6, %v165_v60  ;;  %v185_v24 = vrot.slane %v184_v7, 2  ;;  %v791_v25 = vadd.f32 %v152_v15, %v151_v63 }
  0x3b   :  { %v787_v18 = vadd.f32 %v145_v4, %v144_v58  ;;  %v793_v27 = vadd.f32 %v173_v16, %v172_v1  ;;  %v180_v28 = vrot.slane %v179_v17, 1  ;;  %v205_v29 = vrot.slane %v191_v20, %v740_v8 }
  0x3c   :  { %v796_v30 = vadd.f32 %v159_v19, %v158_v5  ;;  %v186_v31 = vadd.f32 %v185_v24, %v184_v7  ;;  %v206_v32 = vcombine.high %v769_v21, %v769_v21  ;;  %v208_v33 = vcombine.high %v751_v13, %v751_v13 }
  0x3d   :  { %v802_v34 = vadd.f32 %v180_v28, %v179_v17  ;;  %v207_v35 = vcombine.high %v205_v29, %v205_v29  ;;  %v215_v36 = vrot.slane %v751_v13, %v740_v8  ;;  %v233_v37 = vsel %vm132_vm0, %v769_v21, 0.0 }
  0x3e   :  { %v187_v38 = vrot.slane %v186_v31, 1  ;;  %v222_v20 = vrot.slane %v208_v33, %v740_v8  ;;  %v234_v39 = vrot.slane %v233_v37, 4  ;;  %v240_v40 = vsel %vm132_vm0, %v206_v32, 0.0 }
  0x3f   :  { %v223_v41 = vcombine.high %v215_v36, %v215_v36  ;;  %v241_v42 = vrot.slane %v240_v40, 4  ;;  %v247_v43 = vsel %vm132_vm0, %v205_v29, 0.0  ;;  %v254_v44 = vsel %vm132_vm0, %v207_v35, 0.0 }
  0x40   :  { %v812_v45 = vadd.f32 %v187_v38, %v186_v31  ;;  %v224_v46 = vcombine.high %v222_v20, %v222_v20  ;;  %v235_v47 = vadd.f32 %v234_v39, %v233_v37  ;;  %v248_v48 = vrot.slane %v247_v43, 4 }
  0x41   :  { %v242_v49 = vadd.f32 %v241_v42, %v240_v40  ;;  %v255_v50 = vrot.slane %v254_v44, 4  ;;  %v261_v21 = vsel %vm132_vm0, %v215_v36, 0.0  ;;  %v268_v51 = vsel %vm132_vm0, %v223_v41, 0.0 }
  0x42   :  { %v236_v52 = vrot.slane %v235_v47, 2  ;;  %v249_v53 = vadd.f32 %v248_v48, %v247_v43  ;;  %v262_v54 = vrot.slane %v261_v21, 4  ;;  %v269_v55 = vrot.slane %v268_v51, 4 }
  0x43   :  { %v243_v56 = vrot.slane %v242_v49, 2  ;;  %v256_v57 = vadd.f32 %v255_v50, %v254_v44  ;;  %v275_v58 = vsel %vm132_vm0, %v222_v20, 0.0  ;;  %v282_v59 = vsel %vm132_vm0, %v224_v46, 0.0 }
  0x44   :  { %v237_v60 = vadd.f32 %v236_v52, %v235_v47  ;;  %v250_v61 = vrot.slane %v249_v53, 2  ;;  %v263_v62 = vadd.f32 %v262_v54, %v261_v21  ;;  %v270_v63 = vadd.f32 %v269_v55, %v268_v51 }
  0x45   :  { %v244_v1 = vadd.f32 %v243_v56, %v242_v49  ;;  %v257_v2 = vrot.slane %v256_v57, 2  ;;  %v276_v4 = vrot.slane %v275_v58, 4  ;;  %v283_v5 = vrot.slane %v282_v59, 4 }
  0x46   :  { %v238_v6 = vrot.slane %v237_v60, 1  ;;  %v251_v7 = vadd.f32 %v250_v61, %v249_v53  ;;  %v264_v15 = vrot.slane %v263_v62, 2  ;;  %v271_v16 = vrot.slane %v270_v63, 2 }
  0x47   :  { %v245_v17 = vrot.slane %v244_v1, 1  ;;  %v258_v19 = vadd.f32 %v257_v2, %v256_v57  ;;  %v277_v24 = vadd.f32 %v276_v4, %v275_v58  ;;  %v284_v28 = vadd.f32 %v283_v5, %v282_v59 }
  0x48   :  { %v239_v29 = vadd.f32 %v238_v6, %v237_v60  ;;  %v252_v31 = vrot.slane %v251_v7, 1  ;;  %v265_v32 = vadd.f32 %v264_v15, %v263_v62  ;;  %v272_v33 = vadd.f32 %v271_v16, %v270_v63 }
  0x49   :  { %v246_v35 = vadd.f32 %v245_v17, %v244_v1  ;;  %v259_v36 = vrot.slane %v258_v19, 1  ;;  %v278_v37 = vrot.slane %v277_v24, 2  ;;  %v285_v38 = vrot.slane %v284_v28, 2 }
  0x4a   :  { %v253_v20 = vadd.f32 %v252_v31, %v251_v7  ;;  %v266_v39 = vrot.slane %v265_v32, 1  ;;  %v273_v40 = vrot.slane %v272_v33, 1  ;;  %v289_v41 = vmul.f32 %v239_v29, %v785_v14 }
  0x4b   :  { %v260_v42 = vadd.f32 %v259_v36, %v258_v19  ;;  %v279_v43 = vadd.f32 %v278_v37, %v277_v24  ;;  %v286_v44 = vadd.f32 %v285_v38, %v284_v28  ;;  %v290_v46 = vmul.f32 %v246_v35, %v787_v18 }
  0x4c   :  { %v267_v47 = vadd.f32 %v266_v39, %v265_v32  ;;  %v274_v48 = vadd.f32 %v273_v40, %v272_v33  ;;  %v291_v49 = vmul.f32 %v253_v20, %v791_v25  ;;  %v364_v50 = vcombine.high %v771_v22, %v771_v22 }
  0x4d   :  { %v280_v21 = vrot.slane %v279_v43, 1  ;;  %v287_v51 = vrot.slane %v286_v44, 1  ;;  %v292_v52 = vmul.f32 %v260_v42, %v796_v30  ;;  %v305_v53 = vcombine.low %v289_v41, %v290_v46 }
  0x4e   :  { %v293_v54 = vmul.f32 %v267_v47, %v789_v23  ;;  %v294_v14 = vmul.f32 %v274_v48, %v793_v27  ;;  %v371_v55 = vrot.slane %v771_v22, %v740_v8  ;;  %v378_v18 = vrot.slane %v364_v50, %v740_v8 }
  0x4f   :  { %v281_v56 = vadd.f32 %v280_v21, %v279_v43  ;;  %v288_v57 = vadd.f32 %v287_v51, %v286_v44  ;;  %v306_v25 = vcombine.low %v291_v49, %v292_v52  ;;  %v381_v61 = vcombine.high %v775_v26, %v775_v26 }
  0x50   :  { %v307_v58 = vcombine.low %v293_v54, %v294_v14  ;;  %v379_v59 = vcombine.high %v371_v55, %v371_v55  ;;  %v380_v60 = vcombine.high %v378_v18, %v378_v18  ;;  %v315_v27 = vrot.slane %v305_v53, %v749_v12 }
  0x51   :  { %v295_v30 = vmul.f32 %v281_v56, %v802_v34  ;;  %v296_v23 = vmul.f32 %v288_v57, %v812_v45  ;;  %v388_v22 = vrot.slane %v775_v26, %v740_v8  ;;  %v322_v62 = vrot.slane %v306_v25, %v749_v12 }
  0x52   :  { %v395_v63 = vrot.slane %v381_v61, %v740_v8  ;;  %v406_v1 = vsel %vm132_vm0, %v371_v55, 0.0  ;;  %v407_v2 = vsel %vm132_vm0, %v379_v59, 0.0  ;;  %v329_v5 = vrot.slane %v307_v58, %v749_v12 }
  0x53   :  { %v308_v4 = vcombine.low %v295_v30, %v296_v23  ;;  %v408_v6 = vadd.f32 %v407_v2, %v406_v1  ;;  %v409_v34 = vsel %vm132_vm0, %v378_v18, 0.0  ;;  %v396_v45 = vcombine.high %v388_v22, %v388_v22 }
  0x54   :  { %v411_v7 = vsel %vm132_vm0, %v380_v60, 0.0  ;;  %v504_v15 = vsub.s32 0, %v737_v3  ;;  %v81_v17 = vmul.f32 %v746_v11, %v742_v9  ;;  %v508_v19 = vsub.s32 1, %v737_v3 }
  0x55   :  { %v336_v26 = vrot.slane %v308_v4, %v749_v12  ;;  %v410_v16 = vadd.f32 %v409_v34, %v408_v6  ;;  %v397_v24 = vcombine.high %v395_v63, %v395_v63  ;;  %v413_v28 = vsel %vm132_vm0, %v388_v22, 0.0 }
  0x56   :  { %v82_v29 = vmul.f32 %v751_v13, %v744_v10  ;;  %v337_v31 = vcombine.low %v315_v27, %v322_v62  ;;  %v434_v35 = vcombine.high %v81_v17, %v81_v17  ;;  %v441_v36 = vrot.slane %v81_v17, %v740_v8 }
  0x57   :  { %v338_v32 = vcombine.low %v329_v5, %v336_v26  ;;  %v412_v33 = vadd.f32 %v411_v7, %v410_v16  ;;  %v415_v37 = vsel %vm132_vm0, %v396_v45, 0.0  ;;  %v417_v10 = vsel %vm132_vm0, %v395_v63, 0.0 }
  0x58   :  { %v451_v38 = vcombine.high %v82_v29, %v82_v29  ;;  %v458_v20 = vrot.slane %v82_v29, %v740_v8  ;;  %v345_v9 = vrot.slane %v337_v31, %v749_v12  ;;  %v448_v40 = vrot.slane %v434_v35, %v740_v8 }
  0x59   :  { %v352_v11 = vrot.slane %v338_v32, %v749_v12  ;;  %v414_v39 = vadd.f32 %v413_v28, %v412_v33  ;;  %v449_v41 = vcombine.high %v441_v36, %v441_v36  ;;  %v476_v13 = vsel %vm132_vm0, %v441_v36, 0.0 }
  0x5a   :  { %v512_v42 = vsub.s32 2, %v737_v3  ;;  %v516_v43 = vsub.s32 3, %v737_v3  ;;  %v450_v46 = vcombine.high %v448_v40, %v448_v40  ;;  %v479_v48 = vsel %vm132_vm0, %v448_v40, 0.0 }
  0x5b   :  { %v416_v44 = vadd.f32 %v415_v37, %v414_v39  ;;  %v477_v47 = vsel %vm132_vm0, %v449_v41, 0.0  ;;  %v419_v12 = vsel %vm132_vm0, %v397_v24, 0.0  ;;  %v465_v49 = vrot.slane %v451_v38, %v740_v8 }
  0x5c   :  { %v478_v50 = vadd.f32 %v477_v47, %v476_v13  ;;  %v520_v21 = vsub.s32 4, %v737_v3  ;;  %v466_v52 = vcombine.high %v458_v20, %v458_v20  ;;  %v481_v53 = vsel %vm132_vm0, %v450_v46, 0.0 }
  0x5d   :  { %v418_v51 = vadd.f32 %v417_v10, %v416_v44  ;;  %v353_v54 = vcombine.low %v345_v9, %v352_v11  ;;  %v483_v55 = vsel %vm132_vm0, %v458_v20, 0.0  ;;  %v524_v18 = vsub.s32 5, %v737_v3 }
  0x5e   :  { %v480_v14 = vadd.f32 %v479_v48, %v478_v50  ;;  %v467_v59 = vcombine.high %v465_v49, %v465_v49  ;;  %v528_v61 = vsub.s32 6, %v737_v3  ;;  %v485_v30 = vsel %vm132_vm0, %v466_v52, 0.0 }
  0x5f   :  { %v420_v56 = vadd.f32 %v419_v12, %v418_v51  ;;  %v505_v57 = vrot.slane %v353_v54, %v504_v15  ;;  %v509_v25 = vrot.slane %v353_v54, %v508_v19  ;;  %v513_v58 = vrot.slane %v353_v54, %v512_v42 }
  0x60   :  { %v482_v8 = vadd.f32 %v481_v53, %v480_v14  ;;  %v517_v60 = vrot.slane %v353_v54, %v516_v43  ;;  %v521_v23 = vrot.slane %v353_v54, %v520_v21  ;;  %v487_v2 = vsel %vm132_vm0, %v465_v49, 0.0 }
  0x61   :  { %421 = vadd.xlane.f32.xlu0 %v420_v56  ;;  %v543_v27 = vsel %vm542_vm1, %v505_v57, 0.0  ;;  %v544_v22 = vsel %vm542_vm1, %v509_v25, 0.0  ;;  %v546_v1 = vsel %vm542_vm1, %v513_v58, 0.0  ;;  %v525_v4 = vrot.slane %v353_v54, %v524_v18 }
  0x62   :  { %v484_v62 = vadd.f32 %v483_v55, %v482_v8  ;;  %v545_v63 = vadd.f32 %v544_v22, %v543_v27  ;;  %v532_v5 = vsub.s32 7, %v737_v3  ;;  %v548_v6 = vsel %vm542_vm1, %v517_v60, 0.0 }
  0x63   :  { %v489_v7 = vsel %vm132_vm0, %v467_v59, 0.0  ;;  %v529_v15 = vrot.slane %v353_v54, %v528_v61  ;;  %v550_v26 = vsel %vm542_vm1, %v521_v23, 0.0  ;;  %v552_v24 = vsel %vm542_vm1, %v525_v4, 0.0 }
  0x64   :  { %v486_v34 = vadd.f32 %v485_v30, %v484_v62  ;;  %v547_v45 = vadd.f32 %v546_v1, %v545_v63  ;;  %v533_v19 = vrot.slane %v353_v54, %v532_v5  ;;  %v570_v52 = vand.u32 127, %v94_v0 }
  0x65   :  { %v554_v31 = vsel %vm542_vm1, %v529_v15, 0.0 }
  0x66   :  { %v488_v16 = vadd.f32 %v487_v2, %v486_v34  ;;  %v549_v17 = vadd.f32 %v548_v6, %v547_v45  ;;  %v556_v33 = vsel %vm542_vm1, %v533_v19, 0.0  ;;  %vm572_vm3 = vcmp.eq.s32.totalorder %v570_v52, 0 }
  0x67   :  { %vm573_vm4 = vmand %vm571_vm2, %vm572_vm3  ;;  %vm576_vm5 = vcmp.eq.s32.totalorder %v570_v52, 1  ;;  %vm580_vm6 = vcmp.eq.s32.totalorder %v570_v52, 2 }
  0x68   :  { %v490_v28 = vadd.f32 %v489_v7, %v488_v16  ;;  %v551_v29 = vadd.f32 %v550_v26, %v549_v17  ;;  %vm577_vm7 = vmand %vm571_vm2, %vm576_vm5 }
  0x69   :  { %vm581_vm8 = vmand %vm571_vm2, %vm580_vm6 }
  0x6a   :  { %491 = vadd.xlane.f32.xlu0 %v490_v28  ;;  %v553_v32 = vadd.f32 %v552_v24, %v551_v29 }
  0x6c   :  { %v555_v35 = vadd.f32 %v554_v31, %v553_v32 }
  0x6e   :  { %v557_v36 = vadd.f32 %v556_v33, %v555_v35 }
  0x70   :  { %558 = vadd.xlane.f32.xlu1 %v557_v36 }
  0xee   :  { %v422_v37 = vpop.xlane.xlu0 %421 }
  0xef   :  { %v423_v38 = vrot.slane %v422_v37, 4 }
  0xf1   :  { %v424_v20 = vadd.f32 %v423_v38, %v422_v37 }
  0xf3   :  { %v425_v9 = vrot.slane %v424_v20, 2 }
  0xf5   :  { %v426_v11 = vadd.f32 %v425_v9, %v424_v20 }
  0xf7   :  { %v492_v39 = vpop.xlane.xlu0 %491  ;;  %v427_v40 = vrot.slane %v426_v11, 1 }
  0xf8   :  { %v493_v41 = vrot.slane %v492_v39, 4 }
  0xf9   :  { %v428_v10 = vadd.f32 %v427_v40, %v426_v11 }
  0xfa   :  { %v494_v13 = vadd.f32 %v493_v41, %v492_v39 }
  0xfb   :  { %605 = vpush %v428_v10 }
  0xfc   :  { %v495_v42 = vrot.slane %v494_v13, 2 }
  0xfd   :  { %v559_v43 = vpop.xlane.xlu1 %558 }
  0xfe   :  { %v496_v44 = vadd.f32 %v495_v42, %v494_v13  ;;  %v560_v46 = vrot.slane %v559_v43, 4 }
 0x100   :  { %v561_v47 = vadd.f32 %v560_v46, %v559_v43  ;;  %v497_v48 = vrot.slane %v496_v44, 1 }
 0x102   :  { %v562_v12 = vrot.slane %v561_v47, 2  ;;  %v498_v49 = vadd.f32 %v497_v48, %v496_v44 }
 0x104   :  { %v563_v50 = vadd.f32 %v562_v12, %v561_v47  ;;  %607 = vpush %v498_v49 }
 0x106   :  { %v564_v21 = vrot.slane %v563_v50, 1 }
 0x108   :  { %v565_v51 = vadd.f32 %v564_v21, %v563_v50 }
 0x10a   :  { %609 = vpush %v565_v51 }
 0x12c   :  { %s606_s1 = spop %605 }
 0x12d   :  { %v574_v53 = vstv %s606_s1 }
 0x12e   :  { %v575_v54 = vsel %vm573_vm4, %v574_v53, 0.0 }
 0x135   :  { %s608_s4 = spop %607 }
 0x136   :  { %v578_v14 = vstv %s608_s4 }
 0x137   :  { %v579_v55 = vsel %vm577_vm7, %v578_v14, %v575_v54 }
 0x13b   :  { %s610_s7 = spop %609 }
 0x13c   :  { %v582_v18 = vstv %s610_s7 }
 0x13d   :  { %v583_v0 = vsel %vm581_vm8, %v582_v18, %v579_v55 }
 0x13e   :  { %584 = vst [vmem:[#allocation10] sm:$0xff] %v583_v0 }
 0x13f   :  { %675 = shalt.err (!%p672_p6)
}
 0x140   :  { %s676_s11 = scalar_lea.hbm %s898_s2, 128 }
 0x141   :  { %p677_p7 = scmp.ne.s32.totalorder %s898_s2, %s676_s11  ;;  %p680_p8 = scmp.lt.u32.totalorder %s676_s11, %s898_s2 }
 0x143   :  { %p682_p9 = pnand %p680_p8, %p677_p7 }
 0x145   :  { %685 = shalt.err (!%p682_p9)
}
 0x146   :  { %594 = dma.vmem_to_hbm [thread:$0]  %s592_s6, 128, %s898_s2, [#allocation7]  }
 0x147   :  { %690 = dma.done.wait [#allocation7], 128  }
 0x148   :  { %691 = vsyncadd [#allocation7], 4294967168 }
 0x149   :  { %598 = vsyncpa [#allocation6], 1 }
 0x14a   :  { %599 = vsyncpa [#allocation9], 1 }
 0x14b   :  { %600 = vsyncpa [#allocation7], 1 }

</bundles_post_ra>
